<compile_context>
chip_gen: v7x
topology: tpu7x:2x2x1
jax: 0.10.0
libtpu: 0.0.40
codegen_flags: <defaults>
</compile_context>

<pallas_src>
import functools

import jax
import jax.numpy as jnp
import numpy as np
from jax import lax
from jax.experimental import pallas as pl
from jax.experimental.pallas import tpu as pltpu

KS = 3            # conv / pool kernel size
EPS = 1e-5        # nn.InstanceNorm2d default eps
COEFF = 12.0      # SoftGate.COEFF


def lip_kernel(x_ref, wbig_ref, g_ref, b_ref, out_ref, *, C, W):
    """Per-batch-element SimplifiedLIP body in fused-lane (H, W*C) layout.

    x_ref   : (1, H, W*C)        f32   unpadded input, channels fused onto lanes
    wbig_ref: (3*W*C, W*C)       bf16  banded conv weight (dy-major rows)
    g_ref   : (1, W*C)           f32   InstanceNorm gamma, tiled over W
    b_ref   : (1, W*C)           f32   InstanceNorm beta,  tiled over W
    out_ref : (1, Ho, Wo*C)      f32   pooled output, lane-dense
    """
    H = x_ref.shape[1]
    WC = W * C
    Ho, Wo = H // 2, W // 2
    inv_hw = 1.0 / float(H * W)

    xf = x_ref[0]                                  # (H, WC) f32, lane-dense
    xb = xf.astype(jnp.bfloat16)                   # single hoisted bf16 cast

    # ---- 3x3 conv as ONE matmul: P (H, 3*WC) @ Wbig (3*WC, WC) -> acc (H, WC) f32 ----
    # dy row shifts with zero fill (the dx shifts are baked into the banded weight).
    zrow_b = jnp.zeros((1, WC), jnp.bfloat16)
    x_up = jnp.concatenate([zrow_b, xb[:H - 1, :]], axis=0)   # row h -> x[h-1]  (dy=0)
    x_dn = jnp.concatenate([xb[1:, :], zrow_b], axis=0)       # row h -> x[h+1]  (dy=2)
    patches = jnp.concatenate([x_up, xb, x_dn], axis=1)       # (H, 3*WC)
    acc = jnp.dot(patches, wbig_ref[...],
                  preferred_element_type=jnp.float32)         # (H, WC) f32

    # ---- InstanceNorm2d(affine=True), two-pass variance, fused-lane layout ----
    def csum(v):                                   # (1, WC) -> (1, C): sum over W blocks
        out = v[:, 0:C]
        for w in range(1, W):
            out = out + v[:, w * C:(w + 1) * C]
        return out

    def tile_w(v):                                 # (1, C) -> (1, WC)
        return jnp.concatenate([v] * W, axis=1)

    mean_c = csum(jnp.sum(acc, axis=0, keepdims=True)) * inv_hw        # (1, C)
    cen = acc - tile_w(mean_c)                                         # (H, WC)
    var_c = csum(jnp.sum(cen * cen, axis=0, keepdims=True)) * inv_hw   # (1, C) biased var
    inv_std = tile_w(lax.rsqrt(var_c + EPS))                           # (1, WC)
    y = cen * (inv_std * g_ref[...]) + b_ref[...]                      # (H, WC)

    # ---- SoftGate + exp (exact divide: 12x error amplification rules out approx vrcp) ----
    sig = 1.0 / (1.0 + jnp.exp(-y))
    gate = jnp.exp(COEFF * sig)                                        # (H, WC), > 1

    # ---- 3x3 / stride-2 / pad-1 sum pooling, fused-lane shifted adds, no scratch ----
    p = xf * gate                                  # fold x*gate: one dense multiply

    zcol = jnp.zeros((H, C), jnp.float32)
    zrow = jnp.zeros((1, WC), jnp.float32)

    def sumpool3(q):                               # 3x3 stride-1 'same' sum pool
        ql = jnp.concatenate([q[:, C:], zcol], axis=1)          # col w+1 (zero at right)
        qr = jnp.concatenate([zcol, q[:, :WC - C]], axis=1)     # col w-1 (zero at left)
        cs = qr + q + ql                                        # (H, WC)
        cu = jnp.concatenate([cs[1:, :], zrow], axis=0)         # row h+1 (zero at bottom)
        cd = jnp.concatenate([zrow, cs[:H - 1, :]], axis=0)     # row h-1 (zero at top)
        return cd + cs + cu                                     # (H, WC)

    num = sumpool3(p)
    den = sumpool3(gate)                          # never zero: gate > 1 everywhere
    ratio = num / den                             # avg-pool divisor (9) cancels

    # stride-2 subsample once, on the tiny ratio plane: rows 0,2,.. and W-blocks 0,2,..
    rows = jnp.concatenate([ratio[2 * i:2 * i + 1, :] for i in range(Ho)], axis=0)
    out_d = jnp.concatenate(
        [rows[:, 2 * j * C:(2 * j + 1) * C] for j in range(Wo)], axis=1)   # (Ho, Wo*C)

    out_ref[0] = out_d.astype(out_ref.dtype)       # lane-dense store


def simplified_lip_forward(x_nchw, params):
    """SimplifiedLIP forward. x_nchw: (B, C, H, W) float32."""
    w_hwio, gamma, beta = params
    B, C, H, W = x_nchw.shape
    assert H % 2 == 0 and W % 2 == 0, "kernel assumes even spatial dims"
    Ho, Wo = H // 2, W // 2
    WC, WoC = W * C, Wo * C

    # NCHW -> NHWC -> fused-lane (B, H, W*C); NO HBM pre-pad (borders handled in-kernel)
    xf = jnp.transpose(x_nchw, (0, 2, 3, 1)).reshape(B, H, WC)

    # Banded conv weight: Wbig[dy, w_in*C+ci, w_out*C+co] = w[dy, dx, ci, co] for
    # dx = w_in - w_out + 1 in {0,1,2}, else 0.  The zero band at the W edges reproduces
    # the conv's zero padding; pure one-time wrapper data movement.
    shift = np.zeros((KS, W, W), np.float32)
    for dx in range(KS):
        for w_out in range(W):
            w_in = w_out + dx - 1
            if 0 <= w_in < W:
                shift[dx, w_in, w_out] = 1.0
    wbig = jnp.einsum('xio,yxab->yiaob', jnp.asarray(shift), w_hwio)   # (3, W, C, W, C)
    wbig = wbig.reshape(KS * WC, WC).astype(jnp.bfloat16)

    gamma_f = jnp.tile(gamma.reshape(1, C), (1, W))    # (1, W*C)
    beta_f = jnp.tile(beta.reshape(1, C), (1, W))      # (1, W*C)

    kern = functools.partial(lip_kernel, C=C, W=W)
    out_flat = pl.pallas_call(
        kern,
        out_shape=jax.ShapeDtypeStruct((B, Ho, WoC), x_nchw.dtype),
        grid_spec=pltpu.PrefetchScalarGridSpec(
            num_scalar_prefetch=0,
            grid=(B,),
            in_specs=[
                pl.BlockSpec((1, H, WC), lambda b: (b, 0, 0)),
                pl.BlockSpec((KS * WC, WC), lambda b: (0, 0)),
                pl.BlockSpec((1, WC), lambda b: (0, 0)),
                pl.BlockSpec((1, WC), lambda b: (0, 0)),
            ],
            out_specs=pl.BlockSpec((1, Ho, WoC), lambda b: (b, 0, 0)),
        ),
        compiler_params=pltpu.CompilerParams(
            dimension_semantics=("parallel",),          # batch shards across TCs
            vmem_limit_bytes=48 * 1024 * 1024),         # explicit, headroom on all gens
    )(xf, wbig, gamma_f, beta_f)

    out = out_flat.reshape(B, Ho, Wo, C)                # free wrapper reshape
    return jnp.transpose(out, (0, 3, 1, 2))             # back to NCHW


def simplified_lip_reference(x_nchw, params):
    """Pure-JAX reference (PyTorch SimplifiedLIP semantics; conv mirrors the kernel's
    bf16-input / f32-accumulate precision so the check isolates kernel correctness)."""
    w_hwio, gamma, beta = params
    x = jnp.transpose(x_nchw, (0, 2, 3, 1))             # NHWC

    dn = ('NHWC', 'HWIO', 'NHWC')
    y = lax.conv_general_dilated(
        x.astype(jnp.bfloat16), w_hwio.astype(jnp.bfloat16),
        (1, 1), 'SAME', dimension_numbers=dn,
        preferred_element_type=jnp.float32)

    mean = jnp.mean(y, axis=(1, 2), keepdims=True)
    var = jnp.mean((y - mean) ** 2, axis=(1, 2), keepdims=True)
    yn = (y - mean) * lax.rsqrt(var + EPS) * gamma + beta
    gate = jnp.exp(COEFF / (1.0 + jnp.exp(-yn)))

    def sum_pool(a):
        return lax.reduce_window(a, 0.0, lax.add,
                                 (1, KS, KS, 1), (1, 2, 2, 1),
                                 ((0, 0), (1, 1), (1, 1), (0, 0)))

    # avg_pool2d's count_include_pad=True divisor (9) cancels in the LIP ratio
    out = sum_pool(x * gate) / sum_pool(gate)
    return jnp.transpose(out, (0, 3, 1, 2))


if __name__ == "__main__":
    # SimplifiedLIP(channels=8) applied to a (2, 8, 16, 16) input  (W*C = 128 lanes)
    B, C, H, W = 2, 8, 16, 16
    key = jax.random.PRNGKey(0)
    kx, kw, kg, kb = jax.random.split(key, 4)

    x = jax.random.normal(kx, (B, C, H, W), jnp.float32)
    # conv weight in HWIO layout (PyTorch OIHW weight -> w.transpose(2, 3, 1, 0))
    w_hwio = 0.1 * jax.random.normal(kw, (KS, KS, C, C), jnp.float32)
    gamma = 1.0 + 0.1 * jax.random.normal(kg, (C,), jnp.float32)   # IN affine weight
    beta = 0.1 * jax.random.normal(kb, (C,), jnp.float32)          # IN affine bias
    params = (w_hwio, gamma, beta)

    out = jax.block_until_ready(jax.jit(simplified_lip_forward)(x, params))
    ref = jax.block_until_ready(simplified_lip_reference(x, params))

    assert out.shape == (B, C, H // 2, W // 2)
    np.testing.assert_allclose(np.asarray(out), np.asarray(ref),
                               rtol=2e-3, atol=2e-3)

    print("KERNEL_OK")
</pallas_src>

<mosaic_0001>
module attributes {stable_mosaic.version = 11 : i64} {
  func.func @lip_kernel(%arg0: i32, %arg1: memref<1x16x128xf32, #tpu.memory_space<vmem>>, %arg2: memref<384x128xbf16, #tpu.memory_space<vmem>>, %arg3: memref<1x128xf32, #tpu.memory_space<vmem>>, %arg4: memref<1x128xf32, #tpu.memory_space<vmem>>, %arg5: memref<1x8x64xf32, #tpu.memory_space<vmem>>) attributes {dimension_semantics = [#tpu.dimension_semantics<parallel>], iteration_bounds = array<i64: 2>, scalar_prefetch = 0 : i64, scratch_operands = 0 : i64, tpu.core_type = #tpu.core_type<tc>, window_params = [{transform_indices = @transform_0, window_bounds = array<i64: 1, 16, 128>}, {pipeline_mode = #tpu.pipeline_mode<synchronous>, transform_indices = @transform_1, window_bounds = array<i64: 384, 128>}, {pipeline_mode = #tpu.pipeline_mode<synchronous>, transform_indices = @transform_2, window_bounds = array<i64: 1, 128>}, {pipeline_mode = #tpu.pipeline_mode<synchronous>, transform_indices = @transform_3, window_bounds = array<i64: 1, 128>}, {transform_indices = @transform_4, window_bounds = array<i64: 1, 8, 64>}]} {
    %c0 = arith.constant 0 : index
    %c0_0 = arith.constant 0 : index
    %c0_1 = arith.constant 0 : index
    %0 = vector.load %arg1[%c0, %c0_0, %c0_1] : memref<1x16x128xf32, #tpu.memory_space<vmem>>, vector<1x16x128xf32>
    %1 = vector.shape_cast %0 : vector<1x16x128xf32> to vector<16x128xf32>
    %2 = arith.truncf %1 : vector<16x128xf32> to vector<16x128xbf16>
    %cst = arith.constant 0.000000e+00 : bf16
    %3 = vector.broadcast %cst : bf16 to vector<1x128xbf16>
    %4 = vector.extract_strided_slice %2 {offsets = [0, 0], sizes = [15, 128], strides = [1, 1]} : vector<16x128xbf16> to vector<15x128xbf16>
    %5 = tpu.concatenate %3, %4 in 0 : vector<1x128xbf16>, vector<15x128xbf16> -> vector<16x128xbf16>
    %6 = vector.extract_strided_slice %2 {offsets = [1, 0], sizes = [15, 128], strides = [1, 1]} : vector<16x128xbf16> to vector<15x128xbf16>
    %7 = tpu.concatenate %6, %3 in 0 : vector<15x128xbf16>, vector<1x128xbf16> -> vector<16x128xbf16>
    %8 = tpu.concatenate %5, %2, %7 in 1 : vector<16x128xbf16>, vector<16x128xbf16>, vector<16x128xbf16> -> vector<16x384xbf16>
    %c0_2 = arith.constant 0 : index
    %c0_3 = arith.constant 0 : index
    %9 = vector.load %arg2[%c0_2, %c0_3] : memref<384x128xbf16, #tpu.memory_space<vmem>>, vector<384x128xbf16>
    %cst_4 = arith.constant dense<0.000000e+00> : vector<16x128xf32>
    %10 = tpu.matmul %8, %9, %cst_4 {dimension_numbers = #tpu.dot_dimension_numbers<[1], [0], [0], [1], [0, 0, 1, 1], [], []>} : vector<16x384xbf16>, vector<384x128xbf16>, vector<16x128xf32> -> vector<16x128xf32>
    %cst_5 = arith.constant dense<0.000000e+00> : vector<128xf32>
    %11 = vector.multi_reduction <add>, %10, %cst_5 [0] : vector<16x128xf32> to vector<128xf32>
    %12 = vector.shape_cast %11 : vector<128xf32> to vector<1x128xf32>
    %13 = vector.extract_strided_slice %12 {offsets = [0, 0], sizes = [1, 8], strides = [1, 1]} : vector<1x128xf32> to vector<1x8xf32>
    %14 = vector.extract_strided_slice %12 {offsets = [0, 8], sizes = [1, 8], strides = [1, 1]} : vector<1x128xf32> to vector<1x8xf32>
    %15 = arith.addf %13, %14 : vector<1x8xf32>
    %16 = vector.extract_strided_slice %12 {offsets = [0, 16], sizes = [1, 8], strides = [1, 1]} : vector<1x128xf32> to vector<1x8xf32>
    %17 = arith.addf %15, %16 : vector<1x8xf32>
    %18 = vector.extract_strided_slice %12 {offsets = [0, 24], sizes = [1, 8], strides = [1, 1]} : vector<1x128xf32> to vector<1x8xf32>
    %19 = arith.addf %17, %18 : vector<1x8xf32>
    %20 = vector.extract_strided_slice %12 {offsets = [0, 32], sizes = [1, 8], strides = [1, 1]} : vector<1x128xf32> to vector<1x8xf32>
    %21 = arith.addf %19, %20 : vector<1x8xf32>
    %22 = vector.extract_strided_slice %12 {offsets = [0, 40], sizes = [1, 8], strides = [1, 1]} : vector<1x128xf32> to vector<1x8xf32>
    %23 = arith.addf %21, %22 : vector<1x8xf32>
    %24 = vector.extract_strided_slice %12 {offsets = [0, 48], sizes = [1, 8], strides = [1, 1]} : vector<1x128xf32> to vector<1x8xf32>
    %25 = arith.addf %23, %24 : vector<1x8xf32>
    %26 = vector.extract_strided_slice %12 {offsets = [0, 56], sizes = [1, 8], strides = [1, 1]} : vector<1x128xf32> to vector<1x8xf32>
    %27 = arith.addf %25, %26 : vector<1x8xf32>
    %28 = vector.extract_strided_slice %12 {offsets = [0, 64], sizes = [1, 8], strides = [1, 1]} : vector<1x128xf32> to vector<1x8xf32>
    %29 = arith.addf %27, %28 : vector<1x8xf32>
    %30 = vector.extract_strided_slice %12 {offsets = [0, 72], sizes = [1, 8], strides = [1, 1]} : vector<1x128xf32> to vector<1x8xf32>
    %31 = arith.addf %29, %30 : vector<1x8xf32>
    %32 = vector.extract_strided_slice %12 {offsets = [0, 80], sizes = [1, 8], strides = [1, 1]} : vector<1x128xf32> to vector<1x8xf32>
    %33 = arith.addf %31, %32 : vector<1x8xf32>
    %34 = vector.extract_strided_slice %12 {offsets = [0, 88], sizes = [1, 8], strides = [1, 1]} : vector<1x128xf32> to vector<1x8xf32>
    %35 = arith.addf %33, %34 : vector<1x8xf32>
    %36 = vector.extract_strided_slice %12 {offsets = [0, 96], sizes = [1, 8], strides = [1, 1]} : vector<1x128xf32> to vector<1x8xf32>
    %37 = arith.addf %35, %36 : vector<1x8xf32>
    %38 = vector.extract_strided_slice %12 {offsets = [0, 104], sizes = [1, 8], strides = [1, 1]} : vector<1x128xf32> to vector<1x8xf32>
    %39 = arith.addf %37, %38 : vector<1x8xf32>
    %40 = vector.extract_strided_slice %12 {offsets = [0, 112], sizes = [1, 8], strides = [1, 1]} : vector<1x128xf32> to vector<1x8xf32>
    %41 = arith.addf %39, %40 : vector<1x8xf32>
    %42 = vector.extract_strided_slice %12 {offsets = [0, 120], sizes = [1, 8], strides = [1, 1]} : vector<1x128xf32> to vector<1x8xf32>
    %43 = arith.addf %41, %42 : vector<1x8xf32>
    %cst_6 = arith.constant 3.906250e-03 : f32
    %44 = vector.broadcast %cst_6 : f32 to vector<1x8xf32>
    %45 = arith.mulf %43, %44 : vector<1x8xf32>
    %46 = tpu.concatenate %45, %45, %45, %45, %45, %45, %45, %45, %45, %45, %45, %45, %45, %45, %45, %45 in 1 : vector<1x8xf32>, vector<1x8xf32>, vector<1x8xf32>, vector<1x8xf32>, vector<1x8xf32>, vector<1x8xf32>, vector<1x8xf32>, vector<1x8xf32>, vector<1x8xf32>, vector<1x8xf32>, vector<1x8xf32>, vector<1x8xf32>, vector<1x8xf32>, vector<1x8xf32>, vector<1x8xf32>, vector<1x8xf32> -> vector<1x128xf32>
    %47 = vector.broadcast %46 : vector<1x128xf32> to vector<16x128xf32>
    %48 = arith.subf %10, %47 : vector<16x128xf32>
    %49 = arith.mulf %48, %48 : vector<16x128xf32>
    %cst_7 = arith.constant dense<0.000000e+00> : vector<128xf32>
    %50 = vector.multi_reduction <add>, %49, %cst_7 [0] : vector<16x128xf32> to vector<128xf32>
    %51 = vector.shape_cast %50 : vector<128xf32> to vector<1x128xf32>
    %52 = vector.extract_strided_slice %51 {offsets = [0, 0], sizes = [1, 8], strides = [1, 1]} : vector<1x128xf32> to vector<1x8xf32>
    %53 = vector.extract_strided_slice %51 {offsets = [0, 8], sizes = [1, 8], strides = [1, 1]} : vector<1x128xf32> to vector<1x8xf32>
    %54 = arith.addf %52, %53 : vector<1x8xf32>
    %55 = vector.extract_strided_slice %51 {offsets = [0, 16], sizes = [1, 8], strides = [1, 1]} : vector<1x128xf32> to vector<1x8xf32>
    %56 = arith.addf %54, %55 : vector<1x8xf32>
    %57 = vector.extract_strided_slice %51 {offsets = [0, 24], sizes = [1, 8], strides = [1, 1]} : vector<1x128xf32> to vector<1x8xf32>
    %58 = arith.addf %56, %57 : vector<1x8xf32>
    %59 = vector.extract_strided_slice %51 {offsets = [0, 32], sizes = [1, 8], strides = [1, 1]} : vector<1x128xf32> to vector<1x8xf32>
    %60 = arith.addf %58, %59 : vector<1x8xf32>
    %61 = vector.extract_strided_slice %51 {offsets = [0, 40], sizes = [1, 8], strides = [1, 1]} : vector<1x128xf32> to vector<1x8xf32>
    %62 = arith.addf %60, %61 : vector<1x8xf32>
    %63 = vector.extract_strided_slice %51 {offsets = [0, 48], sizes = [1, 8], strides = [1, 1]} : vector<1x128xf32> to vector<1x8xf32>
    %64 = arith.addf %62, %63 : vector<1x8xf32>
    %65 = vector.extract_strided_slice %51 {offsets = [0, 56], sizes = [1, 8], strides = [1, 1]} : vector<1x128xf32> to vector<1x8xf32>
    %66 = arith.addf %64, %65 : vector<1x8xf32>
    %67 = vector.extract_strided_slice %51 {offsets = [0, 64], sizes = [1, 8], strides = [1, 1]} : vector<1x128xf32> to vector<1x8xf32>
    %68 = arith.addf %66, %67 : vector<1x8xf32>
    %69 = vector.extract_strided_slice %51 {offsets = [0, 72], sizes = [1, 8], strides = [1, 1]} : vector<1x128xf32> to vector<1x8xf32>
    %70 = arith.addf %68, %69 : vector<1x8xf32>
    %71 = vector.extract_strided_slice %51 {offsets = [0, 80], sizes = [1, 8], strides = [1, 1]} : vector<1x128xf32> to vector<1x8xf32>
    %72 = arith.addf %70, %71 : vector<1x8xf32>
    %73 = vector.extract_strided_slice %51 {offsets = [0, 88], sizes = [1, 8], strides = [1, 1]} : vector<1x128xf32> to vector<1x8xf32>
    %74 = arith.addf %72, %73 : vector<1x8xf32>
    %75 = vector.extract_strided_slice %51 {offsets = [0, 96], sizes = [1, 8], strides = [1, 1]} : vector<1x128xf32> to vector<1x8xf32>
    %76 = arith.addf %74, %75 : vector<1x8xf32>
    %77 = vector.extract_strided_slice %51 {offsets = [0, 104], sizes = [1, 8], strides = [1, 1]} : vector<1x128xf32> to vector<1x8xf32>
    %78 = arith.addf %76, %77 : vector<1x8xf32>
    %79 = vector.extract_strided_slice %51 {offsets = [0, 112], sizes = [1, 8], strides = [1, 1]} : vector<1x128xf32> to vector<1x8xf32>
    %80 = arith.addf %78, %79 : vector<1x8xf32>
    %81 = vector.extract_strided_slice %51 {offsets = [0, 120], sizes = [1, 8], strides = [1, 1]} : vector<1x128xf32> to vector<1x8xf32>
    %82 = arith.addf %80, %81 : vector<1x8xf32>
    %cst_8 = arith.constant 3.906250e-03 : f32
    %83 = vector.broadcast %cst_8 : f32 to vector<1x8xf32>
    %84 = arith.mulf %82, %83 : vector<1x8xf32>
    %cst_9 = arith.constant 9.99999974E-6 : f32
    %85 = vector.broadcast %cst_9 : f32 to vector<1x8xf32>
    %86 = arith.addf %84, %85 : vector<1x8xf32>
    %87 = math.rsqrt %86 : vector<1x8xf32>
    %88 = tpu.concatenate %87, %87, %87, %87, %87, %87, %87, %87, %87, %87, %87, %87, %87, %87, %87, %87 in 1 : vector<1x8xf32>, vector<1x8xf32>, vector<1x8xf32>, vector<1x8xf32>, vector<1x8xf32>, vector<1x8xf32>, vector<1x8xf32>, vector<1x8xf32>, vector<1x8xf32>, vector<1x8xf32>, vector<1x8xf32>, vector<1x8xf32>, vector<1x8xf32>, vector<1x8xf32>, vector<1x8xf32>, vector<1x8xf32> -> vector<1x128xf32>
    %c0_10 = arith.constant 0 : index
    %c0_11 = arith.constant 0 : index
    %89 = vector.load %arg3[%c0_10, %c0_11] : memref<1x128xf32, #tpu.memory_space<vmem>>, vector<1x128xf32>
    %90 = arith.mulf %88, %89 : vector<1x128xf32>
    %91 = vector.broadcast %90 : vector<1x128xf32> to vector<16x128xf32>
    %92 = arith.mulf %48, %91 : vector<16x128xf32>
    %c0_12 = arith.constant 0 : index
    %c0_13 = arith.constant 0 : index
    %93 = vector.load %arg4[%c0_12, %c0_13] : memref<1x128xf32, #tpu.memory_space<vmem>>, vector<1x128xf32>
    %94 = vector.broadcast %93 : vector<1x128xf32> to vector<16x128xf32>
    %95 = arith.addf %92, %94 : vector<16x128xf32>
    %cst_14 = arith.constant 0.000000e+00 : f32
    %96 = vector.broadcast %cst_14 : f32 to vector<16x128xf32>
    %97 = arith.subf %96, %95 : vector<16x128xf32>
    %98 = math.exp %97 : vector<16x128xf32>
    %cst_15 = arith.constant 1.000000e+00 : f32
    %99 = vector.broadcast %cst_15 : f32 to vector<16x128xf32>
    %100 = arith.addf %99, %98 : vector<16x128xf32>
    %cst_16 = arith.constant 1.000000e+00 : f32
    %101 = vector.broadcast %cst_16 : f32 to vector<16x128xf32>
    %102 = arith.divf %101, %100 : vector<16x128xf32>
    %cst_17 = arith.constant 1.200000e+01 : f32
    %103 = vector.broadcast %cst_17 : f32 to vector<16x128xf32>
    %104 = arith.mulf %103, %102 : vector<16x128xf32>
    %105 = math.exp %104 : vector<16x128xf32>
    %106 = arith.mulf %1, %105 : vector<16x128xf32>
    %cst_18 = arith.constant 0.000000e+00 : f32
    %107 = vector.broadcast %cst_18 : f32 to vector<16x8xf32>
    %cst_19 = arith.constant 0.000000e+00 : f32
    %108 = vector.broadcast %cst_19 : f32 to vector<1x128xf32>
    %109 = vector.extract_strided_slice %106 {offsets = [0, 8], sizes = [16, 120], strides = [1, 1]} : vector<16x128xf32> to vector<16x120xf32>
    %110 = tpu.concatenate %109, %107 in 1 : vector<16x120xf32>, vector<16x8xf32> -> vector<16x128xf32>
    %111 = vector.extract_strided_slice %106 {offsets = [0, 0], sizes = [16, 120], strides = [1, 1]} : vector<16x128xf32> to vector<16x120xf32>
    %112 = tpu.concatenate %107, %111 in 1 : vector<16x8xf32>, vector<16x120xf32> -> vector<16x128xf32>
    %113 = arith.addf %112, %106 : vector<16x128xf32>
    %114 = arith.addf %113, %110 : vector<16x128xf32>
    %115 = vector.extract_strided_slice %114 {offsets = [1, 0], sizes = [15, 128], strides = [1, 1]} : vector<16x128xf32> to vector<15x128xf32>
    %116 = tpu.concatenate %115, %108 in 0 : vector<15x128xf32>, vector<1x128xf32> -> vector<16x128xf32>
    %117 = vector.extract_strided_slice %114 {offsets = [0, 0], sizes = [15, 128], strides = [1, 1]} : vector<16x128xf32> to vector<15x128xf32>
    %118 = tpu.concatenate %108, %117 in 0 : vector<1x128xf32>, vector<15x128xf32> -> vector<16x128xf32>
    %119 = arith.addf %118, %114 : vector<16x128xf32>
    %120 = arith.addf %119, %116 : vector<16x128xf32>
    %121 = vector.extract_strided_slice %105 {offsets = [0, 8], sizes = [16, 120], strides = [1, 1]} : vector<16x128xf32> to vector<16x120xf32>
    %122 = tpu.concatenate %121, %107 in 1 : vector<16x120xf32>, vector<16x8xf32> -> vector<16x128xf32>
    %123 = vector.extract_strided_slice %105 {offsets = [0, 0], sizes = [16, 120], strides = [1, 1]} : vector<16x128xf32> to vector<16x120xf32>
    %124 = tpu.concatenate %107, %123 in 1 : vector<16x8xf32>, vector<16x120xf32> -> vector<16x128xf32>
    %125 = arith.addf %124, %105 : vector<16x128xf32>
    %126 = arith.addf %125, %122 : vector<16x128xf32>
    %127 = vector.extract_strided_slice %126 {offsets = [1, 0], sizes = [15, 128], strides = [1, 1]} : vector<16x128xf32> to vector<15x128xf32>
    %128 = tpu.concatenate %127, %108 in 0 : vector<15x128xf32>, vector<1x128xf32> -> vector<16x128xf32>
    %129 = vector.extract_strided_slice %126 {offsets = [0, 0], sizes = [15, 128], strides = [1, 1]} : vector<16x128xf32> to vector<15x128xf32>
    %130 = tpu.concatenate %108, %129 in 0 : vector<1x128xf32>, vector<15x128xf32> -> vector<16x128xf32>
    %131 = arith.addf %130, %126 : vector<16x128xf32>
    %132 = arith.addf %131, %128 : vector<16x128xf32>
    %133 = arith.divf %120, %132 : vector<16x128xf32>
    %134 = vector.extract_strided_slice %133 {offsets = [0, 0], sizes = [1, 128], strides = [1, 1]} : vector<16x128xf32> to vector<1x128xf32>
    %135 = vector.extract_strided_slice %133 {offsets = [2, 0], sizes = [1, 128], strides = [1, 1]} : vector<16x128xf32> to vector<1x128xf32>
    %136 = vector.extract_strided_slice %133 {offsets = [4, 0], sizes = [1, 128], strides = [1, 1]} : vector<16x128xf32> to vector<1x128xf32>
    %137 = vector.extract_strided_slice %133 {offsets = [6, 0], sizes = [1, 128], strides = [1, 1]} : vector<16x128xf32> to vector<1x128xf32>
    %138 = vector.extract_strided_slice %133 {offsets = [8, 0], sizes = [1, 128], strides = [1, 1]} : vector<16x128xf32> to vector<1x128xf32>
    %139 = vector.extract_strided_slice %133 {offsets = [10, 0], sizes = [1, 128], strides = [1, 1]} : vector<16x128xf32> to vector<1x128xf32>
    %140 = vector.extract_strided_slice %133 {offsets = [12, 0], sizes = [1, 128], strides = [1, 1]} : vector<16x128xf32> to vector<1x128xf32>
    %141 = vector.extract_strided_slice %133 {offsets = [14, 0], sizes = [1, 128], strides = [1, 1]} : vector<16x128xf32> to vector<1x128xf32>
    %142 = tpu.concatenate %134, %135, %136, %137, %138, %139, %140, %141 in 0 : vector<1x128xf32>, vector<1x128xf32>, vector<1x128xf32>, vector<1x128xf32>, vector<1x128xf32>, vector<1x128xf32>, vector<1x128xf32>, vector<1x128xf32> -> vector<8x128xf32>
    %143 = vector.extract_strided_slice %142 {offsets = [0, 0], sizes = [8, 8], strides = [1, 1]} : vector<8x128xf32> to vector<8x8xf32>
    %144 = vector.extract_strided_slice %142 {offsets = [0, 16], sizes = [8, 8], strides = [1, 1]} : vector<8x128xf32> to vector<8x8xf32>
    %145 = vector.extract_strided_slice %142 {offsets = [0, 32], sizes = [8, 8], strides = [1, 1]} : vector<8x128xf32> to vector<8x8xf32>
    %146 = vector.extract_strided_slice %142 {offsets = [0, 48], sizes = [8, 8], strides = [1, 1]} : vector<8x128xf32> to vector<8x8xf32>
    %147 = vector.extract_strided_slice %142 {offsets = [0, 64], sizes = [8, 8], strides = [1, 1]} : vector<8x128xf32> to vector<8x8xf32>
    %148 = vector.extract_strided_slice %142 {offsets = [0, 80], sizes = [8, 8], strides = [1, 1]} : vector<8x128xf32> to vector<8x8xf32>
    %149 = vector.extract_strided_slice %142 {offsets = [0, 96], sizes = [8, 8], strides = [1, 1]} : vector<8x128xf32> to vector<8x8xf32>
    %150 = vector.extract_strided_slice %142 {offsets = [0, 112], sizes = [8, 8], strides = [1, 1]} : vector<8x128xf32> to vector<8x8xf32>
    %151 = tpu.concatenate %143, %144, %145, %146, %147, %148, %149, %150 in 1 : vector<8x8xf32>, vector<8x8xf32>, vector<8x8xf32>, vector<8x8xf32>, vector<8x8xf32>, vector<8x8xf32>, vector<8x8xf32>, vector<8x8xf32> -> vector<8x64xf32>
    %c0_20 = arith.constant 0 : index
    %c0_21 = arith.constant 0 : index
    %c0_22 = arith.constant 0 : index
    %152 = vector.load %arg5[%c0_20, %c0_21, %c0_22] : memref<1x8x64xf32, #tpu.memory_space<vmem>>, vector<1x8x64xf32>
    %153 = vector.shape_cast %152 : vector<1x8x64xf32> to vector<8x64xf32>
    %154 = vector.shape_cast %151 : vector<8x64xf32> to vector<1x8x64xf32>
    tpu.vector_store %arg5[%c0_20, %c0_21, %c0_22], %154 {strides = array<i32>} : memref<1x8x64xf32, #tpu.memory_space<vmem>>, vector<1x8x64xf32>,
    return
  }
  func.func @transform_0(%arg0: i32) -> (i32, i32, i32) {
    %c0_i32 = arith.constant 0 : i32
    %c0_i32_0 = arith.constant 0 : i32
    %c0_i32_1 = arith.constant 0 : i32
    return %arg0, %c0_i32, %c0_i32_0 : i32, i32, i32
  }
  func.func @transform_1(%arg0: i32) -> (i32, i32) {
    %c0_i32 = arith.constant 0 : i32
    %c0_i32_0 = arith.constant 0 : i32
    %c0_i32_1 = arith.constant 0 : i32
    return %c0_i32, %c0_i32_0 : i32, i32
  }
  func.func @transform_2(%arg0: i32) -> (i32, i32) {
    %c0_i32 = arith.constant 0 : i32
    %c0_i32_0 = arith.constant 0 : i32
    %c0_i32_1 = arith.constant 0 : i32
    return %c0_i32, %c0_i32_0 : i32, i32
  }
  func.func @transform_3(%arg0: i32) -> (i32, i32) {
    %c0_i32 = arith.constant 0 : i32
    %c0_i32_0 = arith.constant 0 : i32
    %c0_i32_1 = arith.constant 0 : i32
    return %c0_i32, %c0_i32_0 : i32, i32
  }
  func.func @transform_4(%arg0: i32) -> (i32, i32, i32) {
    %c0_i32 = arith.constant 0 : i32
    %c0_i32_0 = arith.constant 0 : i32
    %c0_i32_1 = arith.constant 0 : i32
    return %arg0, %c0_i32, %c0_i32_0 : i32, i32, i32
  }
}

</mosaic_0001>

<bundles_post_ra>
// kernel: simplified_lip_forward.1
= control target key start
LH: loop header
LB: loop body
LE: loop exit
PB: predicated region body
PF: predicated region fallthrough
CT: control target
= control target key end

     0   :  { %s1216_s15 = smov 0   ;;  %s1493_s0 = inlined_call_operand.vmem [shape: f32[2,16,128], index: 0, kind: input, shape index: {}]   ;;  %s1494_s1 = inlined_call_operand.vmem [shape: bf16[384,128], index: 1, kind: input, shape index: {}]   ;;  %s1495_s2 = inlined_call_operand.vmem [shape: f32[1,128], index: 2, kind: input, shape index: {}]   ;;  %s1496_s3 = inlined_call_operand.vmem [shape: f32[1,128], index: 3, kind: input, shape index: {}]   ;;  %s1497_s4 = inlined_call_operand.vmem [shape: f32[2,8,64], index: 4, kind: output, shape index: {}]  }
   0x1 LB: > { %s1012_s16 = sadd.s32 4294967295, %s1172_s15   ;;  %p1016_p0 = scmp.ge.s32.totalorder %s1172_s15, 1  ;;  %s1172_s15 = sphi %s1216_s15, %s14_s15  }
   0x2   : > { %p162_p1 = scmp.lt.s32.totalorder %s1172_s15, 3 }
   0x4   : > { %p163_p2 = pnand %p1016_p0, %p162_p1 }
   0x5   : > { %v1124_v0 = vld [vmem:[%s1494_s1 + $0x40] sm:$0xff] (!%p163_p2)   ;;  %v1174_v1 = vmov (!%p163_p2), 0.0   ;;  %v1127_v4 = vld [vmem:[%s1494_s1 + $0x48] sm:$0xff] (!%p163_p2)   ;;  %vm1175_vm0 = vmmov (!%p163_p2), 0   ;;  %v1130_v7 = vld [vmem:[%s1494_s1 + $0x50] sm:$0xff] (!%p163_p2)   ;;  %p187_p3 = scmp.lt.s32.totalorder (!%p163_p2), %s1012_s16, 1 }
   0x6   : > { %166 = sbr.rel (%p163_p2) target bundleno = 1219 (0x4c3), region = 36  ;;  %1079 = vmatprep.subr.bf16.mxu1 (!%p163_p2), %v1174_v1  ;;  %v1125_v2 = vld [vmem:[%s1494_s1] sm:$0xff] (!%p163_p2)   ;;  %1048 = vmatprep.subr.bf16.mxu0 (!%p163_p2), %v1124_v0  ;;  %v1128_v5 = vld [vmem:[%s1494_s1 + $0x8] sm:$0xff] (!%p163_p2)   ;;  %v1131_v8 = vld [vmem:[%s1494_s1 + $0x10] sm:$0xff] (!%p163_p2)   ;;  %vm208_vm1 = vcmask (!%p163_p2), 1040384   ;;  %vm215_vm3 = vcmask (!%p163_p2), 1047552  }
   0x7   : > { %v1126_v3 = vld [vmem:[%s1494_s1 + $0x80] sm:$0xff] (!%p163_p2)   ;;  %1049 = vmatpush3.bf16.msra.mxu0 (!%p163_p2), %v1125_v2  ;;  %1095 = vmatprep.mubr.msk.bf16.mxu1 (!%p163_p2), %vm1175_vm0, %v1174_v1  ;;  %v1129_v6 = vld [vmem:[%s1494_s1 + $0x88] sm:$0xff] (!%p163_p2)   ;;  %v1132_v9 = vld [vmem:[%s1494_s1 + $0x90] sm:$0xff] (!%p163_p2)   ;;  %vm209_vm2 = vsmask.f32 (!%p163_p2), 256  ;;  %s1176_s21 = smov (!%p163_p2), 104  }
   0x8   : > { %1080 = vmatpush3.bf16.msra.mxu1 (!%p163_p2), %v1126_v3  ;;  %1050 = vmatprep.subr.bf16.mxu0 (!%p163_p2), %v1127_v4  ;;  %v1133_v10 = vld [vmem:[%s1494_s1 + $0x58] sm:$0xff] (!%p163_p2)   ;;  %v1136_v13 = vld [vmem:[%s1494_s1 + $0x60] sm:$0xff] (!%p163_p2)   ;;  %v1139_v16 = vld [vmem:[%s1494_s1 + $0x68] sm:$0xff] (!%p163_p2)   ;;  %vm216_vm4 = vsmask.f32 (!%p163_p2), 7424  ;;  %s1177_s22 = smov (!%p163_p2), 120  }
   0x9   : > { %1081 = vmatprep.subr.bf16.mxu1 (!%p163_p2), %v1174_v1  ;;  %v1134_v11 = vld [vmem:[%s1494_s1 + $0x18] sm:$0xff] (!%p163_p2)   ;;  %v1137_v14 = vld [vmem:[%s1494_s1 + $0x20] sm:$0xff] (!%p163_p2)   ;;  %v1140_v17 = vld [vmem:[%s1494_s1 + $0x28] sm:$0xff] (!%p163_p2)   ;;  %s1178_s23 = smov (!%p163_p2), 96   ;;  %s1179_s24 = smov (!%p163_p2), 112   ;;  %vm608_vm7 = vcmask (!%p163_p2), 64512  }
   0xa   : > { %v1135_v12 = vld [vmem:[%s1494_s1 + $0x98] sm:$0xff] (!%p163_p2)   ;;  %v1138_v15 = vld [vmem:[%s1494_s1 + $0xa0] sm:$0xff] (!%p163_p2)   ;;  %v1141_v18 = vld [vmem:[%s1494_s1 + $0xa8] sm:$0xff] (!%p163_p2)   ;;  %s1180_s25 = smov (!%p163_p2), 80   ;;  %s1181_s26 = smov (!%p163_p2), 88   ;;  %vm610_vm8 = vcmask (!%p163_p2), 130048  }
   0xb   : > { %1051 = vmatpush3.bf16.msra.mxu0 (!%p163_p2), %v1128_v5  ;;  %v1142_v19 = vld [vmem:[%s1494_s1 + $0x70] sm:$0xff] (!%p163_p2)   ;;  %v1145_v22 = vld [vmem:[%s1494_s1 + $0x78] sm:$0xff] (!%p163_p2)   ;;  %vm210_vm5 = vmand (!%p163_p2), %vm208_vm1, %vm209_vm2  ;;  %s1183_s28 = smov (!%p163_p2), 72   ;;  %s1184_s29 = smov (!%p163_p2), 48   ;;  %vm612_vm9 = vcmask (!%p163_p2), 195584   ;;  %vm614_vm10 = vcmask (!%p163_p2), 261120  }
   0xc   : > { %1082 = vmatpush3.bf16.msra.mxu1 (!%p163_p2), %v1129_v6  ;;  %1052 = vmatprep.subr.bf16.mxu0 (!%p163_p2), %v1130_v7  ;;  %v1143_v20 = vld [vmem:[%s1494_s1 + $0x30] sm:$0xff] (!%p163_p2)   ;;  %v1146_v26 = vld [vmem:[%s1494_s1 + $0x38] sm:$0xff] (!%p163_p2)   ;;  %vm217_vm6 = vmand (!%p163_p2), %vm215_vm3, %vm216_vm4  ;;  %s1185_s30 = smov (!%p163_p2), 56   ;;  %s1186_s5 = smov (!%p163_p2), 32   ;;  %vm616_vm11 = vcmask (!%p163_p2), 326656   ;;  %vm618_vm12 = vcmask (!%p163_p2), 392192  }
   0xd   : > { %1083 = vmatprep.subr.bf16.mxu1 %v1174_v1  ;;  %s1499_s16 = smov (!%p187_p3, %s1012_s16), 1  ;;  %v1144_v21 = vld [vmem:[%s1494_s1 + $0xb0] sm:$0xff]   ;;  %v1147_v29 = vld [vmem:[%s1494_s1 + $0xb8] sm:$0xff]   ;;  %s1187_s6 = smov 40   ;;  %vm620_vm13 = vcmask 457728   ;;  %vm622_vm14 = vcmask 523264  }
   0xe   : > { %s1047_s27 = sshll.u32 %s1499_s16, 4  ;;  %s1188_s7 = smov 16   ;;  %vm624_vm15 = vcmask 588800   ;;  %vm626_vm0 = vcmask 654336   ;;  %vm628_vm2 = vcmask 719872   ;;  %vm630_vm3 = vcmask 785408  }
   0xf   : > { %1053 = vmatpush3.bf16.msra.mxu0 %v1131_v8  ;;  %s191_s8 = scalar_lea.vmem %s1493_s0, %s1047_s27  ;;  %s1182_s27 = smov 64   ;;  %vm632_vm4 = vcmask 850944  }
  0x10   : > { %1084 = vmatpush3.bf16.msra.mxu1 %v1132_v9  ;;  %1054 = vmatprep.subr.bf16.mxu0 %v1133_v10  ;;  %v1307_v23 = vld [vmem:[%s191_s8] sm:$0xff]  ;;  %v1309_v24 = vld [vmem:[%s191_s8 + $0x8] sm:$0xff]  ;;  %s1189_s8 = smov 24   ;;  %s1190_s9 = smov 8  }
  0x11   : > { %1085 = vmatprep.subr.bf16.mxu1 %v1174_v1  ;;  %v199_v25 = vpack.c.bf16 %v1309_v24, %v1307_v23  ;;  %s1019_s14 = sshll.u32 %s1499_s16, 3 }
  0x12   : > { %s195_s19 = scalar_lea.vmem %s1497_s4, %s1019_s14 }
  0x13   : > { %1055 = vmatpush3.bf16.msra.mxu0 %v1134_v11  ;;  %443 = vmatprep.mubr.bf16.mxu0 %v199_v25  ;;  %v201_v27 = vshrl.u32 %v199_v25, 16  ;;  %v204_v28 = vshll.u32 %v199_v25, 16 }
  0x14   : > { %1086 = vmatpush3.bf16.msra.mxu1 %v1135_v12  ;;  %1056 = vmatprep.subr.bf16.mxu0 %v1136_v13 }
  0x15   : > { %1087 = vmatprep.subr.bf16.mxu1 %v1174_v1  ;;  %v203_v30 = vrot.slane %v201_v27, 7  ;;  %v212_v31 = vrot.slane %v204_v28, 1 }
  0x17   : > { %1057 = vmatpush3.bf16.msra.mxu0 %v1137_v14  ;;  %v206_v32 = vor.u32 %v204_v28, %v203_v30  ;;  %v213_v33 = vor.u32 %v212_v31, %v201_v27 }
  0x18   : > { %1088 = vmatpush3.bf16.msra.mxu1 %v1138_v15  ;;  %1058 = vmatprep.subr.bf16.mxu0 %v1139_v16 }
  0x19   : > { %1089 = vmatprep.subr.bf16.mxu1 %v1174_v1  ;;  %v211_v34 = vsel %vm210_vm5, 0, %v206_v32  ;;  %v218_v35 = vsel %vm217_vm6, %v213_v33, 0  ;;  %vm634_vm5 = vcmask 916480   ;;  %vm636_vm6 = vcmask 982016  }
  0x1b   : > { %1059 = vmatpush3.bf16.msra.mxu0 %v1140_v17 }
  0x1c   : > { %1090 = vmatpush3.bf16.msra.mxu1 %v1141_v18  ;;  %1060 = vmatprep.subr.bf16.mxu0 %v1142_v19 }
  0x1d   : > { %1091 = vmatprep.subr.bf16.mxu1 %v1174_v1 }
  0x1f   : > { %1061 = vmatpush3.bf16.msra.mxu0 %v1143_v20 }
  0x20   : > { %1092 = vmatpush3.bf16.msra.mxu1 %v1144_v21  ;;  %1062 = vmatprep.subr.bf16.mxu0 %v1145_v22 }
  0x21   : > { %1093 = vmatprep.subr.bf16.mxu1 %v1174_v1 }
  0x23   : > { %1063 = vmatpush3.bf16.msra.mxu0 %v1146_v26 }
  0x24   : > { %1094 = vmatpush3.bf16.msra.mxu1 %v1147_v29 }
  0x26   : > { %444 = vmatmul.mubr.bf16.vlgmr.msra.gmra.mrb[0].mxu0 %v211_v34 }
  0x27   : > { %1096 = vmatmul.mubr.bf16.vlgmr.msra.gmra.mrb[0].mxu1 %v218_v35 }
  0xf9   : > { %v1064_v36 = vpop.f32.mrb[0].mxu0 }
  0xfa   : > { %v486_v37 = vpop.f32.mrb[0].mxu1  ;;  %v1065_v38 = vpop.f32.mrb[1].mxu0 }
  0xfb   : > { %v1066_v39 = vadd.f32 %v1065_v38, %v1064_v36  ;;  %v1097_v40 = vpop.f32.mrb[1].mxu1  ;;  %v1067_v41 = vpop.f32.mrb[2].mxu0 }
  0xfc   : > { %v489_v42 = vpop.f32.mrb[2].mxu1  ;;  %v1068_v43 = vpop.f32.mrb[3].mxu0 }
  0xfd   : > { %v1322_v44 = vadd.f32 %v1066_v39, %v486_v37  ;;  %v1069_v45 = vadd.f32 %v1068_v43, %v1067_v41  ;;  %v1098_v46 = vpop.f32.mrb[3].mxu1  ;;  %v638_v43 = vlaneseq }
  0xff   : > { %v1324_v47 = vadd.f32 %v1069_v45, %v489_v42 }
 0x101   : > { %v493_v48 = vadd.f32 %v1324_v47, %v1322_v44 }
 0x103   : > { %v494_v49 = vrot.slane %v493_v48, 4 }
 0x105   : > { %v495_v50 = vadd.f32 %v494_v49, %v493_v48 }
 0x107   : > { %v496_v51 = vrot.slane %v495_v50, 2 }
 0x109   : > { %v497_v52 = vadd.f32 %v496_v51, %v495_v50  ;;  %v1369_v50 = vshrl.u32 %v638_v43, 7 }
 0x10b   : > { %v498_v53 = vrot.slane %v497_v52, 1 }
 0x10d   : > { %v499_v54 = vadd.f32 %v498_v53, %v497_v52 }
 0x10f   : > { %509 = vrot.lane.b32.xlu1 %v499_v54, %s1176_s21  ;;  %501 = vrot.lane.b32.xlu0 %v499_v54, %s1177_s22 }
 0x113   : > { %513 = vrot.lane.b32.xlu1 %v499_v54, %s1178_s23  ;;  %505 = vrot.lane.b32.xlu0 %v499_v54, %s1179_s24 }
 0x117   : > { %521 = vrot.lane.b32.xlu1 %v499_v54, %s1180_s25  ;;  %517 = vrot.lane.b32.xlu0 %v499_v54, %s1181_s26 }
 0x11b   : > { %529 = vrot.lane.b32.xlu1 %v499_v54, %s1182_s27  ;;  %525 = vrot.lane.b32.xlu0 %v499_v54, %s1183_s28 }
 0x11f   : > { %537 = vrot.lane.b32.xlu1 %v499_v54, %s1184_s29  ;;  %533 = vrot.lane.b32.xlu0 %v499_v54, %s1185_s30 }
 0x123   : > { %545 = vrot.lane.b32.xlu1 %v499_v54, %s1186_s5  ;;  %541 = vrot.lane.b32.xlu0 %v499_v54, %s1187_s6 }
 0x127   : > { %553 = vrot.lane.b32.xlu1 %v499_v54, %s1188_s7  ;;  %549 = vrot.lane.b32.xlu0 %v499_v54, %s1189_s8 }
 0x12b   : > { %557 = vrot.lane.b32.xlu0 %v499_v54, %s1190_s9 }
 0x181   : > { %v510_v55 = vpop.permute.xlu1 %509  ;;  %v502_v56 = vpop.permute.xlu0 %501 }
 0x182   : > { %v504_v57 = vadd.f32 %v502_v56, %v499_v54 }
 0x185   : > { %v514_v58 = vpop.permute.xlu1 %513  ;;  %v506_v59 = vpop.permute.xlu0 %505 }
 0x186   : > { %v508_v60 = vadd.f32 %v506_v59, %v504_v57 }
 0x188   : > { %v512_v61 = vadd.f32 %v510_v55, %v508_v60  ;;  %v640_v55 = vsub.s32 0, %v1369_v50 }
 0x189   : > { %v522_v62 = vpop.permute.xlu1 %521  ;;  %v518_v63 = vpop.permute.xlu0 %517 }
 0x18a   : > { %v516_v0 = vadd.f32 %v514_v58, %v512_v61 }
 0x18c   : > { %v520_v1 = vadd.f32 %v518_v63, %v516_v0 }
 0x18d   : > { %v530_v2 = vpop.permute.xlu1 %529  ;;  %v526_v3 = vpop.permute.xlu0 %525 }
 0x18e   : > { %v524_v4 = vadd.f32 %v522_v62, %v520_v1 }
 0x190   : > { %v528_v5 = vadd.f32 %v526_v3, %v524_v4 }
 0x191   : > { %v538_v6 = vpop.permute.xlu1 %537  ;;  %v534_v7 = vpop.permute.xlu0 %533 }
 0x192   : > { %v532_v8 = vadd.f32 %v530_v2, %v528_v5 }
 0x194   : > { %v536_v9 = vadd.f32 %v534_v7, %v532_v8 }
 0x195   : > { %v542_v10 = vpop.permute.xlu0 %541  ;;  %v546_v12 = vpop.permute.xlu1 %545 }
 0x196   : > { %v540_v11 = vadd.f32 %v538_v6, %v536_v9 }
 0x198   : > { %v544_v13 = vadd.f32 %v542_v10, %v540_v11 }
 0x199   : > { %v550_v14 = vpop.permute.xlu0 %549  ;;  %v554_v17 = vpop.permute.xlu1 %553 }
 0x19a   : > { %v548_v15 = vadd.f32 %v546_v12, %v544_v13 }
 0x19c   : > { %v552_v16 = vadd.f32 %v550_v14, %v548_v15 }
 0x19d   : > { %v558_v19 = vpop.permute.xlu0 %557 }
 0x19e   : > { %v556_v18 = vadd.f32 %v554_v17, %v552_v16 }
 0x1a0   : > { %v560_v20 = vadd.f32 %v558_v19, %v556_v18 }
 0x1a2   : > { %v561_v21 = vmul.f32 0.00390625, %v560_v20 }
 0x1a4   : > { %566 = vrot.lane.b32.xlu0 %v561_v21, %s1188_s7  ;;  %563 = vrot.lane.b32.xlu1 %v561_v21, %s1190_s9 }
 0x1a8   : > { %572 = vrot.lane.b32.xlu0 %v561_v21, %s1186_s5  ;;  %569 = vrot.lane.b32.xlu1 %v561_v21, %s1189_s8 }
 0x1ac   : > { %578 = vrot.lane.b32.xlu0 %v561_v21, %s1184_s29  ;;  %575 = vrot.lane.b32.xlu1 %v561_v21, %s1187_s6 }
 0x1b0   : > { %584 = vrot.lane.b32.xlu0 %v561_v21, %s1182_s27  ;;  %581 = vrot.lane.b32.xlu1 %v561_v21, %s1185_s30 }
 0x1b4   : > { %590 = vrot.lane.b32.xlu0 %v561_v21, %s1180_s25  ;;  %587 = vrot.lane.b32.xlu1 %v561_v21, %s1183_s28 }
 0x1b8   : > { %596 = vrot.lane.b32.xlu0 %v561_v21, %s1178_s23  ;;  %593 = vrot.lane.b32.xlu1 %v561_v21, %s1181_s26 }
 0x1bc   : > { %602 = vrot.lane.b32.xlu0 %v561_v21, %s1179_s24  ;;  %599 = vrot.lane.b32.xlu1 %v561_v21, %s1176_s21 }
 0x1c0   : > { %605 = vrot.lane.b32.xlu1 %v561_v21, %s1177_s22 }
 0x216   : > { %v567_v22 = vpop.permute.xlu0 %566  ;;  %v564_v25 = vpop.permute.xlu1 %563 }
 0x217   : > { %v609_v26 = vsel %vm608_vm7, %v561_v21, %v564_v25 }
 0x218   : > { %v611_v28 = vsel %vm610_vm8, %v609_v26, %v567_v22 }
 0x21a   : > { %v573_v27 = vpop.permute.xlu0 %572  ;;  %v570_v29 = vpop.permute.xlu1 %569 }
 0x21b   : > { %v613_v30 = vsel %vm612_vm9, %v611_v28, %v570_v29 }
 0x21c   : > { %v615_v32 = vsel %vm614_vm10, %v613_v30, %v573_v27 }
 0x21e   : > { %v579_v31 = vpop.permute.xlu0 %578  ;;  %v576_v33 = vpop.permute.xlu1 %575 }
 0x21f   : > { %v617_v34 = vsel %vm616_vm11, %v615_v32, %v576_v33 }
 0x220   : > { %v619_v36 = vsel %vm618_vm12, %v617_v34, %v579_v31 }
 0x222   : > { %v585_v35 = vpop.permute.xlu0 %584  ;;  %v582_v37 = vpop.permute.xlu1 %581 }
 0x223   : > { %v621_v38 = vsel %vm620_vm13, %v619_v36, %v582_v37 }
 0x224   : > { %v623_v40 = vsel %vm622_vm14, %v621_v38, %v585_v35 }
 0x226   : > { %v591_v39 = vpop.permute.xlu0 %590  ;;  %v588_v41 = vpop.permute.xlu1 %587 }
 0x227   : > { %v625_v42 = vsel %vm624_vm15, %v623_v40, %v588_v41 }
 0x228   : > { %v627_v46 = vsel %vm626_vm0, %v625_v42, %v591_v39 }
 0x22a   : > { %v597_v45 = vpop.permute.xlu0 %596  ;;  %v594_v48 = vpop.permute.xlu1 %593 }
 0x22b   : > { %v629_v49 = vsel %vm628_vm2, %v627_v46, %v594_v48 }
 0x22c   : > { %v631_v51 = vsel %vm630_vm3, %v629_v49, %v597_v45 }
 0x22e   : > { %v600_v52 = vpop.permute.xlu1 %599  ;;  %v603_v53 = vpop.permute.xlu0 %602 }
 0x22f   : > { %v633_v54 = vsel %vm632_vm4, %v631_v51, %v600_v52 }
 0x230   : > { %v635_v56 = vsel %vm634_vm5, %v633_v54, %v603_v53 }
 0x232   : > { %v606_v57 = vpop.permute.xlu1 %605 }
 0x233   : > { %v637_v58 = vsel %vm636_vm6, %v635_v56, %v606_v57 }
 0x234   : > { %v641_v59 = vrot.slane %v637_v58, %v640_v55 }
 0x236   : > { %v1379_v60 = vsub.f32 %v1322_v44, %v641_v59  ;;  %v1382_v61 = vsub.f32 %v1324_v47, %v641_v59 }
 0x238   : > { %v644_v62 = vmul.f32 %v1379_v60, %v1379_v60  ;;  %v645_v63 = vmul.f32 %v1382_v61, %v1382_v61 }
 0x23a   : > { %v646_v0 = vadd.f32 %v645_v63, %v644_v62 }
 0x23c   : > { %v647_v1 = vrot.slane %v646_v0, 4 }
 0x23e   : > { %v648_v2 = vadd.f32 %v647_v1, %v646_v0 }
 0x240   : > { %v649_v3 = vrot.slane %v648_v2, 2 }
 0x242   : > { %v650_v4 = vadd.f32 %v649_v3, %v648_v2 }
 0x244   : > { %v651_v5 = vrot.slane %v650_v4, 1 }
 0x246   : > { %v652_v6 = vadd.f32 %v651_v5, %v650_v4 }
 0x248   : > { %658 = vrot.lane.b32.xlu1 %v652_v6, %s1179_s24  ;;  %654 = vrot.lane.b32.xlu0 %v652_v6, %s1177_s22 }
 0x24c   : > { %666 = vrot.lane.b32.xlu1 %v652_v6, %s1178_s23  ;;  %662 = vrot.lane.b32.xlu0 %v652_v6, %s1176_s21 }
 0x250   : > { %674 = vrot.lane.b32.xlu1 %v652_v6, %s1180_s25  ;;  %670 = vrot.lane.b32.xlu0 %v652_v6, %s1181_s26 }
 0x254   : > { %682 = vrot.lane.b32.xlu1 %v652_v6, %s1182_s27  ;;  %678 = vrot.lane.b32.xlu0 %v652_v6, %s1183_s28 }
 0x258   : > { %690 = vrot.lane.b32.xlu1 %v652_v6, %s1184_s29  ;;  %686 = vrot.lane.b32.xlu0 %v652_v6, %s1185_s30 }
 0x25c   : > { %698 = vrot.lane.b32.xlu1 %v652_v6, %s1186_s5  ;;  %694 = vrot.lane.b32.xlu0 %v652_v6, %s1187_s6 }
 0x260   : > { %706 = vrot.lane.b32.xlu1 %v652_v6, %s1188_s7  ;;  %702 = vrot.lane.b32.xlu0 %v652_v6, %s1189_s8 }
 0x264   : > { %710 = vrot.lane.b32.xlu0 %v652_v6, %s1190_s9 }
 0x2ba   : > { %v659_v44 = vpop.permute.xlu1 %658  ;;  %v655_v47 = vpop.permute.xlu0 %654 }
 0x2bb   : > { %v657_v7 = vadd.f32 %v655_v47, %v652_v6 }
 0x2bd   : > { %v661_v8 = vadd.f32 %v659_v44, %v657_v7  ;;  %v778_v7 = vld [vmem:[%s1495_s2] sm:$0x1] }
 0x2be   : > { %v667_v9 = vpop.permute.xlu1 %666  ;;  %v663_v10 = vpop.permute.xlu0 %662 }
 0x2bf   : > { %v665_v11 = vadd.f32 %v663_v10, %v661_v8 }
 0x2c1   : > { %v669_v12 = vadd.f32 %v667_v9, %v665_v11 }
 0x2c2   : > { %v675_v13 = vpop.permute.xlu1 %674  ;;  %v671_v14 = vpop.permute.xlu0 %670 }
 0x2c3   : > { %v673_v15 = vadd.f32 %v671_v14, %v669_v12 }
 0x2c5   : > { %v677_v16 = vadd.f32 %v675_v13, %v673_v15  ;;  %v1044_v13 = vld [vmem:[%s1496_s3] ss:$0 sm:$0xff] }
 0x2c6   : > { %v683_v17 = vpop.permute.xlu1 %682  ;;  %v679_v18 = vpop.permute.xlu0 %678 }
 0x2c7   : > { %v681_v19 = vadd.f32 %v679_v18, %v677_v16 }
 0x2c9   : > { %v685_v20 = vadd.f32 %v683_v17, %v681_v19 }
 0x2ca   : > { %v691_v21 = vpop.permute.xlu1 %690  ;;  %v687_v22 = vpop.permute.xlu0 %686 }
 0x2cb   : > { %v689_v25 = vadd.f32 %v687_v22, %v685_v20 }
 0x2cd   : > { %v693_v26 = vadd.f32 %v691_v21, %v689_v25 }
 0x2ce   : > { %v699_v27 = vpop.permute.xlu1 %698  ;;  %v695_v28 = vpop.permute.xlu0 %694 }
 0x2cf   : > { %v697_v29 = vadd.f32 %v695_v28, %v693_v26 }
 0x2d1   : > { %v701_v30 = vadd.f32 %v699_v27, %v697_v29 }
 0x2d2   : > { %v703_v31 = vpop.permute.xlu0 %702  ;;  %v707_v33 = vpop.permute.xlu1 %706 }
 0x2d3   : > { %v705_v32 = vadd.f32 %v703_v31, %v701_v30 }
 0x2d5   : > { %v709_v34 = vadd.f32 %v707_v33, %v705_v32 }
 0x2d6   : > { %v711_v35 = vpop.permute.xlu0 %710 }
 0x2d7   : > { %v713_v36 = vadd.f32 %v711_v35, %v709_v34 }
 0x2d9   : > { %v714_v37 = vmul.f32 0.00390625, %v713_v36 }
 0x2db   : > { %v715_v38 = vadd.f32 1e-05, %v714_v37 }
 0x2dd   : > { %1148 = vrsqrt.f32 %v715_v38 }
 0x2e7   : > { %v1149_v39 = vpop.eup %1148 }
 0x2e8   : > { %721 = vrot.lane.b32.xlu0 %v1149_v39, %s1188_s7  ;;  %718 = vrot.lane.b32.xlu1 %v1149_v39, %s1190_s9 }
 0x2ec   : > { %727 = vrot.lane.b32.xlu0 %v1149_v39, %s1186_s5  ;;  %724 = vrot.lane.b32.xlu1 %v1149_v39, %s1189_s8 }
 0x2f0   : > { %733 = vrot.lane.b32.xlu0 %v1149_v39, %s1184_s29  ;;  %730 = vrot.lane.b32.xlu1 %v1149_v39, %s1187_s6 }
 0x2f4   : > { %739 = vrot.lane.b32.xlu0 %v1149_v39, %s1182_s27  ;;  %736 = vrot.lane.b32.xlu1 %v1149_v39, %s1185_s30 }
 0x2f8   : > { %745 = vrot.lane.b32.xlu0 %v1149_v39, %s1180_s25  ;;  %742 = vrot.lane.b32.xlu1 %v1149_v39, %s1183_s28 }
 0x2fc   : > { %751 = vrot.lane.b32.xlu0 %v1149_v39, %s1178_s23  ;;  %748 = vrot.lane.b32.xlu1 %v1149_v39, %s1181_s26 }
 0x300   : > { %757 = vrot.lane.b32.xlu0 %v1149_v39, %s1179_s24  ;;  %754 = vrot.lane.b32.xlu1 %v1149_v39, %s1176_s21 }
 0x304   : > { %760 = vrot.lane.b32.xlu1 %v1149_v39, %s1177_s22 }
 0x35a   : > { %v722_v40 = vpop.permute.xlu0 %721  ;;  %v719_v41 = vpop.permute.xlu1 %718 }
 0x35b   : > { %v763_v42 = vsel %vm608_vm7, %v1149_v39, %v719_v41 }
 0x35c   : > { %v764_v45 = vsel %vm610_vm8, %v763_v42, %v722_v40 }
 0x35e   : > { %v728_v43 = vpop.permute.xlu0 %727  ;;  %v725_v46 = vpop.permute.xlu1 %724 }
 0x35f   : > { %v765_v48 = vsel %vm612_vm9, %v764_v45, %v725_v46 }
 0x360   : > { %v766_v51 = vsel %vm614_vm10, %v765_v48, %v728_v43 }
 0x362   : > { %v734_v49 = vpop.permute.xlu0 %733  ;;  %v731_v52 = vpop.permute.xlu1 %730 }
 0x363   : > { %v767_v53 = vsel %vm616_vm11, %v766_v51, %v731_v52 }
 0x364   : > { %v768_v56 = vsel %vm618_vm12, %v767_v53, %v734_v49 }
 0x366   : > { %v740_v54 = vpop.permute.xlu0 %739  ;;  %v737_v57 = vpop.permute.xlu1 %736 }
 0x367   : > { %v769_v58 = vsel %vm620_vm13, %v768_v56, %v737_v57 }
 0x368   : > { %v770_v62 = vsel %vm622_vm14, %v769_v58, %v740_v54 }
 0x36a   : > { %v746_v59 = vpop.permute.xlu0 %745  ;;  %v743_v63 = vpop.permute.xlu1 %742 }
 0x36b   : > { %v771_v0 = vsel %vm624_vm15, %v770_v62, %v743_v63  ;;  %vm839_vm15 = vcmask 1046528  }
 0x36c   : > { %v772_v2 = vsel %vm626_vm0, %v771_v0, %v746_v59  ;;  %vm918_vm0 = vcmask 1041408  }
 0x36e   : > { %v752_v1 = vpop.permute.xlu0 %751  ;;  %v749_v3 = vpop.permute.xlu1 %748 }
 0x36f   : > { %v773_v4 = vsel %vm628_vm2, %v772_v2, %v749_v3  ;;  %vm920_vm2 = vcmask 1042432  }
 0x370   : > { %v774_v5 = vsel %vm630_vm3, %v773_v4, %v752_v1  ;;  %vm922_vm3 = vcmask 1043456  }
 0x372   : > { %v755_v6 = vpop.permute.xlu1 %754  ;;  %v758_v44 = vpop.permute.xlu0 %757 }
 0x373   : > { %v775_v47 = vsel %vm632_vm4, %v774_v5, %v755_v6  ;;  %vm924_vm4 = vcmask 1044480  }
 0x374   : > { %v776_v8 = vsel %vm634_vm5, %v775_v47, %v758_v44  ;;  %vm926_vm5 = vcmask 1045504  }
 0x376   : > { %v761_v9 = vpop.permute.xlu1 %760 }
 0x377   : > { %v777_v10 = vsel %vm636_vm6, %v776_v8, %v761_v9 }
 0x378   : > { %v779_v11 = vmul.f32 %v778_v7, %v777_v10 }
 0x37a   : > { %v783_v12 = vrot.slane %v779_v11, %v640_v55 }
 0x37c   : > { %v784_v14 = vmul.f32 %v783_v12, %v1379_v60  ;;  %v785_v15 = vmul.f32 %v783_v12, %v1382_v61 }
 0x37e   : > { %v793_v16 = vadd.f32 %v1044_v13, %v784_v14  ;;  %v794_v17 = vadd.f32 %v1044_v13, %v785_v15 }
 0x380   : > { %v795_v18 = vsub.f32 0.0, %v793_v16  ;;  %v796_v19 = vsub.f32 0.0, %v794_v17 }
 0x382   : > { %v797_v20 = vmul.f32 1.442695, %v795_v18  ;;  %v799_v21 = vmul.f32 1.442695, %v796_v19 }
 0x384   : > { %1150 = vpow2.f32 %v797_v20 }
 0x385   : > { %1152 = vpow2.f32 %v799_v21 }
 0x38e   : > { %v1151_v22 = vpop.eup %1150 }
 0x38f   : > { %v1153_v25 = vpop.eup %1152  ;;  %v801_v50 = vadd.f32 1.0, %v1151_v22 }
 0x390   : > { %v802_v55 = vadd.f32 1.0, %v1153_v25 }
 0x391   : > { %1154 = vrcp.f32 %v801_v50 }
 0x392   : > { %1156 = vrcp.f32 %v802_v55 }
 0x39b   : > { %v1155_v26 = vpop.eup %1154 }
 0x39c   : > { %v1157_v27 = vpop.eup %1156  ;;  %v807_v28 = vmul.f32 12.0, %v1155_v26 }
 0x39d   : > { %v808_v60 = vmul.f32 12.0, %v1157_v27 }
 0x39e   : > { %v809_v29 = vmul.f32 1.442695, %v807_v28 }
 0x39f   : > { %v811_v61 = vmul.f32 1.442695, %v808_v60 }
 0x3a0   : > { %1158 = vpow2.f32 %v809_v29 }
 0x3a1   : > { %1160 = vpow2.f32 %v811_v61 }
 0x3aa   : > { %v1159_v30 = vpop.eup %1158 }
 0x3ab   : > { %859 = vrot.lane.b32.xlu1 %v1159_v30, %s1177_s22  ;;  %867 = vrot.lane.b32.xlu0 %v1159_v30, %s1190_s9  ;;  %v1161_v31 = vpop.eup %1160  ;;  %v813_v32 = vmul.f32 %v1159_v30, %v1307_v23 }
 0x3ac   : > { %v814_v33 = vmul.f32 %v1161_v31, %v1309_v24 }
 0x3af   : > { %861 = vrot.lane.b32.xlu1 %v1161_v31, %s1177_s22  ;;  %869 = vrot.lane.b32.xlu0 %v1161_v31, %s1190_s9 }
 0x3b3   : > { %817 = vrot.lane.b32.xlu1 %v813_v32, %s1177_s22  ;;  %825 = vrot.lane.b32.xlu0 %v813_v32, %s1190_s9 }
 0x3b7   : > { %819 = vrot.lane.b32.xlu1 %v814_v33, %s1177_s22  ;;  %827 = vrot.lane.b32.xlu0 %v814_v33, %s1190_s9 }
 0x41d   : > { %v860_v34 = vpop.permute.xlu1 %859  ;;  %v868_v35 = vpop.permute.xlu0 %867 }
 0x41e   : > { %v873_v36 = vsel %vm608_vm7, 0.0, %v868_v35  ;;  %v865_v38 = vsel %vm636_vm6, %v860_v34, 0.0 }
 0x41f   : > { %v875_v37 = vadd.f32 %v1159_v30, %v873_v36 }
 0x421   : > { %v877_v39 = vadd.f32 %v875_v37, %v865_v38  ;;  %v862_v40 = vpop.permute.xlu1 %861  ;;  %v870_v23 = vpop.permute.xlu0 %869 }
 0x422   : > { %v874_v41 = vsel %vm608_vm7, 0.0, %v870_v23  ;;  %v866_v24 = vsel %vm636_vm6, %v862_v40, 0.0 }
 0x423   : > { %v887_v42 = vrot.slane %v877_v39, 7  ;;  %v876_v43 = vadd.f32 %v1161_v31, %v874_v41  ;;  %v881_v52 = vrot.slane %v877_v39, 1 }
 0x425   : > { %v892_v45 = vsel %vm208_vm1, 0.0, %v887_v42  ;;  %v878_v46 = vadd.f32 %v876_v43, %v866_v24  ;;  %v818_v48 = vpop.permute.xlu1 %817  ;;  %v826_v49 = vpop.permute.xlu0 %825 }
 0x426   : > { %v831_v51 = vsel %vm608_vm7, 0.0, %v826_v49  ;;  %v893_v57 = vadd.f32 %v892_v45, %v877_v39  ;;  %v823_v58 = vsel %vm636_vm6, %v818_v48, 0.0 }
 0x427   : > { %v882_v53 = vrot.slane %v878_v46, 1  ;;  %v888_v54 = vrot.slane %v878_v46, 7  ;;  %v833_v56 = vadd.f32 %v831_v51, %v813_v32 }
 0x429   : > { %v883_v59 = vsel %vm839_vm15, %v881_v52, %v882_v53  ;;  %v889_v62 = vsel %vm208_vm1, %v887_v42, %v888_v54  ;;  %v835_v63 = vadd.f32 %v833_v56, %v823_v58  ;;  %v820_v0 = vpop.permute.xlu1 %819  ;;  %v828_v1 = vpop.permute.xlu0 %827  ;;  %v886_v5 = vsel %vm839_vm15, %v882_v53, 0.0 }
 0x42a   : > { %v894_v2 = vadd.f32 %v889_v62, %v878_v46  ;;  %v895_v3 = vadd.f32 %v893_v57, %v883_v59  ;;  %v832_v4 = vsel %vm608_vm7, 0.0, %v828_v1  ;;  %v824_v7 = vsel %vm636_vm6, %v820_v0, 0.0 }
 0x42b   : > { %v834_v6 = vadd.f32 %v832_v4, %v814_v33  ;;  %v847_v47 = vrot.slane %v835_v63, 7  ;;  %v840_v11 = vrot.slane %v835_v63, 1 }
 0x42c   : > { %v896_v44 = vadd.f32 %v894_v2, %v886_v5  ;;  %1162 = vrcp.f32 %v895_v3 }
 0x42d   : > { %v836_v8 = vadd.f32 %v834_v6, %v824_v7  ;;  %v852_v12 = vsel %vm208_vm1, 0.0, %v847_v47 }
 0x42e   : > { %1164 = vrcp.f32 %v896_v44  ;;  %v853_v15 = vadd.f32 %v852_v12, %v835_v63 }
 0x42f   : > { %v841_v9 = vrot.slane %v836_v8, 1  ;;  %v848_v10 = vrot.slane %v836_v8, 7 }
 0x431   : > { %v849_v13 = vsel %vm208_vm1, %v847_v47, %v848_v10  ;;  %v842_v14 = vsel %vm839_vm15, %v840_v11, %v841_v9  ;;  %v845_v19 = vsel %vm839_vm15, %v841_v9, 0.0 }
 0x432   : > { %v854_v16 = vadd.f32 %v849_v13, %v836_v8  ;;  %v855_v17 = vadd.f32 %v853_v15, %v842_v14 }
 0x434   : > { %v856_v20 = vadd.f32 %v854_v16, %v845_v19 }
 0x436   : > { %v1163_v18 = vpop.eup %1162 }
 0x437   : > { %v898_v21 = vmul.f32 %v1163_v18, %v855_v17 }
 0x438   : > { %v1165_v22 = vpop.eup %1164 }
 0x439   : > { %v900_v25 = vmul.f32 %v1165_v22, %v856_v20  ;;  %v902_v50 = vrot.slane %v898_v21, 1  ;;  %v904_v55 = vrot.slane %v898_v21, 2  ;;  %v906_v26 = vrot.slane %v898_v21, 3 }
 0x43b   : > { %v909_v27 = vrot.slane %v900_v25, 4  ;;  %v917_v28 = vsel %vm208_vm1, %v898_v21, %v902_v50  ;;  %v911_v29 = vrot.slane %v900_v25, 5  ;;  %v913_v30 = vrot.slane %v900_v25, 6 }
 0x43c   : > { %v919_v60 = vsel %vm918_vm0, %v917_v28, %v904_v55  ;;  %v915_v32 = vrot.slane %v900_v25, 7 }
 0x43d   : > { %v921_v61 = vsel %vm920_vm2, %v919_v60, %v906_v26 }
 0x43e   : > { %v923_v31 = vsel %vm922_vm3, %v921_v61, %v909_v27 }
 0x43f   : > { %v925_v33 = vsel %vm924_vm4, %v923_v31, %v911_v29 }
 0x440   : > { %v927_v34 = vsel %vm926_vm5, %v925_v33, %v913_v30 }
 0x441   : > { %v928_v35 = vsel %vm839_vm15, %v927_v34, %v915_v32 }
 0x442   : > { %933 = vrot.lane.b32.xlu1 %v928_v35, %s1179_s24  ;;  %930 = vrot.lane.b32.xlu0 %v928_v35, %s1177_s22 }
 0x446   : > { %939 = vrot.lane.b32.xlu1 %v928_v35, %s1178_s23  ;;  %936 = vrot.lane.b32.xlu0 %v928_v35, %s1176_s21 }
 0x44a   : > { %945 = vrot.lane.b32.xlu1 %v928_v35, %s1180_s25  ;;  %942 = vrot.lane.b32.xlu0 %v928_v35, %s1181_s26 }
 0x44e   : > { %948 = vrot.lane.b32.xlu0 %v928_v35, %s1183_s28 }
 0x4b4   : > { %v934_v36 = vpop.permute.xlu1 %933  ;;  %v931_v37 = vpop.permute.xlu0 %930 }
 0x4b5   : > { %v951_v38 = vsel %vm608_vm7, %v928_v35, %v931_v37 }
 0x4b6   : > { %v952_v40 = vsel %vm610_vm8, %v951_v38, %v934_v36 }
 0x4b8   : > { %v940_v39 = vpop.permute.xlu1 %939  ;;  %v937_v23 = vpop.permute.xlu0 %936 }
 0x4b9   : > { %v953_v41 = vsel %vm612_vm9, %v952_v40, %v937_v23 }
 0x4ba   : > { %v954_v42 = vsel %vm614_vm10, %v953_v41, %v940_v39 }
 0x4bc   : > { %v943_v43 = vpop.permute.xlu0 %942  ;;  %v946_v24 = vpop.permute.xlu1 %945 }
 0x4bd   : > { %v955_v45 = vsel %vm616_vm11, %v954_v42, %v943_v43 }
 0x4be   : > { %v956_v46 = vsel %vm618_vm12, %v955_v45, %v946_v24 }
 0x4c0   : > { %v949_v48 = vpop.permute.xlu0 %948 }
 0x4c1   : > { %v957_v49 = vsel %vm620_vm13, %v956_v46, %v949_v48 }
 0x4c2   : > { %958 = vst.msk [vmem:[%s195_s19] sm:$0xff] %vm622_vm14, %v957_v49 }
 0x4c3 PF: > { %s14_s15 = sadd.s32 1, %s1172_s15  }
 0x4c4   : > { %p11_p4 = scmp.ge.s32.totalorder %s14_s15, 4  }
 0x4c6   :  { %13 = sbr.rel (!%p11_p4) target bundleno = 1 (0x1), region = 66 }

</bundles_post_ra>
